<compile_context>
chip_gen: v7x
topology: tpu7x:2x2x1
jax: 0.10.0
libtpu: 0.0.40
codegen_flags: <defaults>
</compile_context>

<pallas_src>
import jax
import jax.numpy as jnp
from jax.experimental import pallas as pl
from jax.experimental.pallas import tpu as pltpu


_VMEM_TILE_BUDGET = 20 * 1024 * 1024   # per-step tile budget (fits v7x VMEM)
_VMEM_LIMIT_BYTES = 32 * 1024 * 1024   # scoped VMEM limit handed to Mosaic


def _round_up(v, m):
    return ((v + m - 1) // m) * m


def local_op_kernel(x_ref, w1_ref, w2_ref, bias_ref, o_ref):
    """One grid step: bt groups x s samples.

    x_ref:    (bt*s, d)  bf16 input rows (group-major)
    w1_ref:   (d,  Cp)   bf16 conv1 weight with BN1 scale folded in
    w2_ref:   (Cp, Cp)   bf16 conv2 weight with BN2 scale folded in
    bias_ref: (2,  Cp)   f32 [BN1 shift; BN2 shift]
    o_ref:    (bt, Cp)   f32 max-pooled features per group
    """
    bt, cp = o_ref.shape
    s = x_ref.shape[0] // bt

    # bf16 MXU matmuls with f32 accumulation; bias / ReLU / pool stay f32.
    h1 = jnp.dot(x_ref[...], w1_ref[...], preferred_element_type=jnp.float32)
    h1 = jnp.maximum(h1 + bias_ref[0:1, :], 0.0)            # BN1 shift + ReLU
    h2 = jnp.dot(h1.astype(jnp.bfloat16), w2_ref[...],
                 preferred_element_type=jnp.float32)
    h2 = jnp.maximum(h2 + bias_ref[1:2, :], 0.0)            # BN2 shift + ReLU

    # adaptive_max_pool1d(1) == max over the s samples of each group.
    # The wrapper guarantees s % 8 == 0, so this reshape is a pure sublane
    # regroup (no VMEM copy) and the max is an XLU sublane reduce.
    o_ref[...] = jnp.max(h2.reshape(bt, s, cp), axis=1)


def _pick_group_block(B, s, d, Cp):
    """Largest 8-aligned groups-per-step (bt) under the VMEM budget.

    Targets ~2048 matmul rows (bt*s) per step (amortizes ~0.35us/step grid
    overhead and MXU fill/drain -- with K as small as d, M is the only
    utilization lever), while keeping >=4 grid steps when B allows (>=2 per
    v7x TensorCore so DMA overlaps compute), else >=2, else 1."""
    d_pad = _round_up(d, 128)              # x tile is lane-padded in VMEM

    def footprint(bt):
        rows = bt * s
        x_b = 2 * rows * d_pad * 2                      # bf16 x, double-buffered
        inter = rows * Cp * (4 + 2 + 4)                 # h1 f32 + h1 bf16 + h2 f32
        w_b = 2 * (d_pad * Cp * 2 + Cp * Cp * 2 + 2 * Cp * 4)   # conservative
        o_b = 2 * bt * Cp * 4                           # f32 out, double-buffered
        return x_b + inter + w_b + o_b

    bt = max(8, _round_up(pl.cdiv(2048, s), 8))         # ~2048 rows per step
    while bt > 8 and footprint(bt) > _VMEM_TILE_BUDGET:
        bt -= 8
    if B >= 32:                                         # keep >= 4 steps
        bt = min(bt, max(8, (B // 4) // 8 * 8))
    elif B >= 16:                                       # keep >= 2 steps
        bt = min(bt, max(8, (B // 2) // 8 * 8))
    return min(bt, _round_up(B, 8))                     # never inflate tiny B


def _build_call(steps, bt, s, d, Cp, B_pad, single_buffer_consts):
    const_kw = {"pipeline_mode": pl.Buffered(1)} if single_buffer_consts else {}
    flops = 2 * B_pad * s * (d * Cp + Cp * Cp)
    bytes_accessed = (B_pad * s * d * 2 + d * Cp * 2 + Cp * Cp * 2
                      + 2 * Cp * 4 + B_pad * Cp * 4)
    return pl.pallas_call(
        local_op_kernel,
        out_shape=jax.ShapeDtypeStruct((B_pad, Cp), jnp.float32),
        grid_spec=pltpu.PrefetchScalarGridSpec(
            num_scalar_prefetch=0,
            grid=(steps,),
            in_specs=[
                pl.BlockSpec((bt * s, d), lambda i: (i, 0)),
                pl.BlockSpec((d, Cp), lambda i: (0, 0), **const_kw),
                pl.BlockSpec((Cp, Cp), lambda i: (0, 0), **const_kw),
                pl.BlockSpec((2, Cp), lambda i: (0, 0), **const_kw),
            ],
            out_specs=pl.BlockSpec((bt, Cp), lambda i: (i, 0)),
        ),
        compiler_params=pltpu.CompilerParams(
            dimension_semantics=("parallel",),
            vmem_limit_bytes=_VMEM_LIMIT_BYTES),
        cost_estimate=pl.CostEstimate(flops=flops, transcendentals=0,
                                      bytes_accessed=bytes_accessed),
    )


def local_op(x, w1, w2, bn1_params, bn2_params):
    """x: (b, n, s, d) float32. w1: (C, d), w2: (C, C). Returns (b, C, n)."""
    b, n, s, d = x.shape
    C = w1.shape[0]
    B = b * n
    eps = 1e-5

    g1, be1, rm1, rv1 = bn1_params
    g2, be2, rm2, rv2 = bn2_params
    scale1 = g1 / jnp.sqrt(rv1 + eps)
    bias1 = be1 - rm1 * scale1
    scale2 = g2 / jnp.sqrt(rv2 + eps)
    bias2 = be2 - rm2 * scale2

    # Fold BN scales into the conv weights; ReLU between layers forbids
    # folding the shifts through w2, so they stay as kernel-side biases.
    w1t = w1.T * scale1[None, :]                            # (d, C)
    w2t = w2.T * scale2[None, :]                            # (C, C)

    # Lane-dense channel padding: padded cols / biases are 0 -> relu/max keep
    # them exactly 0 -> sliced off below.
    Cp = _round_up(C, 128)
    pad_c = Cp - C
    w1t_p = jnp.pad(w1t, ((0, 0), (0, pad_c))).astype(jnp.bfloat16)
    w2t_p = jnp.pad(w2t, ((0, pad_c), (0, pad_c))).astype(jnp.bfloat16)
    biases = jnp.stack([jnp.pad(bias1, (0, pad_c)),
                        jnp.pad(bias2, (0, pad_c))]).astype(jnp.float32)

    # Pad s to a multiple of 8 by replicating sample 0 of every group: the
    # per-group max is unchanged and the in-kernel pooling reshape stays a
    # pure sublane regroup.
    s_pad = _round_up(s, 8)
    xg = x.astype(jnp.float32).reshape(B, s, d)
    if s_pad != s:
        xg = jnp.concatenate(
            [xg, jnp.broadcast_to(xg[:, :1, :], (B, s_pad - s, d))], axis=1)

    bt = _pick_group_block(B, s_pad, d, Cp)
    steps = pl.cdiv(B, bt)
    if steps > 1:
        steps = _round_up(steps, 2)      # even step count: balanced megacore
    B_pad = steps * bt
    if B_pad != B:                       # zero-pad extra groups; sliced off
        xg = jnp.concatenate(
            [xg, jnp.zeros((B_pad - B, s_pad, d), jnp.float32)], axis=0)

    x_2d = xg.reshape(B_pad * s_pad, d).astype(jnp.bfloat16)
    args = (x_2d, w1t_p, w2t_p, biases)

    try:
        out = _build_call(steps, bt, s_pad, d, Cp, B_pad, True)(*args)
        out = jax.block_until_ready(out)
    except Exception:
        # pipeline_mode=pl.Buffered(1) not supported on this jax version:
        # fall back to default double-buffered weight operands.
        out = _build_call(steps, bt, s_pad, d, Cp, B_pad, False)(*args)

    out = out[:B, :C]                      # drop group / lane padding
    out = out.reshape(b, n, C)             # (b, n, C)
    # TODO(synk): for bt >= 128 the output transpose could be fused into the
    # kernel (XLU transpose of the pooled tile); kept outside so bt < 128
    # output stores stay lane-dense.
    return jnp.transpose(out, (0, 2, 1))   # (b, C, n)


def local_op_reference(x, w1, w2, bn1_params, bn2_params):
    """Plain-JAX f32 reference mirroring the PyTorch forward (eval-mode BN)."""
    b, n, s, d = x.shape
    C = w1.shape[0]
    eps = 1e-5
    g1, be1, rm1, rv1 = bn1_params
    g2, be2, rm2, rv2 = bn2_params

    xc = x.reshape(b * n, s, d)                       # (B, S, D)
    h1 = jnp.einsum("bsd,cd->bsc", xc, w1)
    h1 = (h1 - rm1) / jnp.sqrt(rv1 + eps) * g1 + be1
    h1 = jnp.maximum(h1, 0.0)
    h2 = jnp.einsum("bsc,kc->bsk", h1, w2)
    h2 = (h2 - rm2) / jnp.sqrt(rv2 + eps) * g2 + be2
    h2 = jnp.maximum(h2, 0.0)
    pooled = jnp.max(h2, axis=1)                      # (B, C)
    return jnp.transpose(pooled.reshape(b, n, C), (0, 2, 1))


if __name__ == "__main__":
    key = jax.random.PRNGKey(0)
    b, n, s, d = 2, 8, 16, 32          # input groups / samples / features
    C = 64                             # out_channels

    kx, kw1, kw2, kg1, kb1, kg2, kb2 = jax.random.split(key, 7)
    x = jax.random.normal(kx, (b, n, s, d), dtype=jnp.float32)

    # Conv1d weights (kernel_size=1, bias=False): shape (out_ch, in_ch)
    w1 = jax.random.normal(kw1, (C, d), dtype=jnp.float32) * 0.1
    w2 = jax.random.normal(kw2, (C, C), dtype=jnp.float32) * 0.1

    # BatchNorm1d params: gamma, beta, running_mean, running_var
    bn1 = (jax.random.normal(kg1, (C,), jnp.float32) * 0.1 + 1.0,
           jax.random.normal(kb1, (C,), jnp.float32) * 0.1,
           jnp.zeros((C,), jnp.float32),
           jnp.ones((C,), jnp.float32))
    bn2 = (jax.random.normal(kg2, (C,), jnp.float32) * 0.1 + 1.0,
           jax.random.normal(kb2, (C,), jnp.float32) * 0.1,
           jnp.zeros((C,), jnp.float32),
           jnp.ones((C,), jnp.float32))

    out = jax.block_until_ready(local_op(x, w1, w2, bn1, bn2))
    ref = jax.block_until_ready(local_op_reference(x, w1, w2, bn1, bn2))

    assert out.shape == (b, C, n), out.shape
    # Matmuls run in bf16 on the MXU -> relaxed tolerance vs f32 reference.
    assert jnp.allclose(out, ref, atol=5e-2, rtol=5e-2), \
        float(jnp.max(jnp.abs(out - ref)))
    print("KERNEL_OK")
</pallas_src>

<mosaic_0001>
module attributes {stable_mosaic.version = 11 : i64} {
  func.func @local_op_kernel(%arg0: i32, %arg1: memref<128x32xbf16, #tpu.memory_space<vmem>>, %arg2: memref<32x128xbf16, #tpu.memory_space<vmem>>, %arg3: memref<128x128xbf16, #tpu.memory_space<vmem>>, %arg4: memref<2x128xf32, #tpu.memory_space<vmem>>, %arg5: memref<8x128xf32, #tpu.memory_space<vmem>>) attributes {dimension_semantics = [#tpu.dimension_semantics<parallel>], iteration_bounds = array<i64: 2>, scalar_prefetch = 0 : i64, scratch_operands = 0 : i64, tpu.core_type = #tpu.core_type<tc>, window_params = [{transform_indices = @transform_0, window_bounds = array<i64: 128, 32>}, {pipeline_mode = #tpu.pipeline_mode<synchronous>, transform_indices = @transform_1, window_bounds = array<i64: 32, 128>}, {pipeline_mode = #tpu.pipeline_mode<synchronous>, transform_indices = @transform_2, window_bounds = array<i64: 128, 128>}, {pipeline_mode = #tpu.pipeline_mode<synchronous>, transform_indices = @transform_3, window_bounds = array<i64: 2, 128>}, {transform_indices = @transform_4, window_bounds = array<i64: 8, 128>}]} {
    %c0 = arith.constant 0 : index
    %c0_0 = arith.constant 0 : index
    %0 = vector.load %arg1[%c0, %c0_0] : memref<128x32xbf16, #tpu.memory_space<vmem>>, vector<128x32xbf16>
    %c0_1 = arith.constant 0 : index
    %c0_2 = arith.constant 0 : index
    %1 = vector.load %arg2[%c0_1, %c0_2] : memref<32x128xbf16, #tpu.memory_space<vmem>>, vector<32x128xbf16>
    %cst = arith.constant dense<0.000000e+00> : vector<128x128xf32>
    %2 = tpu.matmul %0, %1, %cst {dimension_numbers = #tpu.dot_dimension_numbers<[1], [0], [0], [1], [0, 0, 1, 1], [], []>} : vector<128x32xbf16>, vector<32x128xbf16>, vector<128x128xf32> -> vector<128x128xf32>
    %c0_3 = arith.constant 0 : index
    %c0_4 = arith.constant 0 : index
    %3 = vector.load %arg4[%c0_3, %c0_4] : memref<2x128xf32, #tpu.memory_space<vmem>>, vector<1x128xf32>
    %4 = vector.broadcast %3 : vector<1x128xf32> to vector<128x128xf32>
    %5 = arith.addf %2, %4 : vector<128x128xf32>
    %cst_5 = arith.constant 0.000000e+00 : f32
    %6 = vector.broadcast %cst_5 : f32 to vector<128x128xf32>
    %7 = arith.maximumf %5, %6 : vector<128x128xf32>
    %8 = arith.truncf %7 : vector<128x128xf32> to vector<128x128xbf16>
    %c0_6 = arith.constant 0 : index
    %c0_7 = arith.constant 0 : index
    %9 = vector.load %arg3[%c0_6, %c0_7] : memref<128x128xbf16, #tpu.memory_space<vmem>>, vector<128x128xbf16>
    %cst_8 = arith.constant dense<0.000000e+00> : vector<128x128xf32>
    %10 = tpu.matmul %8, %9, %cst_8 {dimension_numbers = #tpu.dot_dimension_numbers<[1], [0], [0], [1], [0, 0, 1, 1], [], []>} : vector<128x128xbf16>, vector<128x128xbf16>, vector<128x128xf32> -> vector<128x128xf32>
    %c1 = arith.constant 1 : index
    %c0_9 = arith.constant 0 : index
    %11 = vector.load %arg4[%c1, %c0_9] : memref<2x128xf32, #tpu.memory_space<vmem>>, vector<1x128xf32>
    %12 = vector.broadcast %11 : vector<1x128xf32> to vector<128x128xf32>
    %13 = arith.addf %10, %12 : vector<128x128xf32>
    %cst_10 = arith.constant 0.000000e+00 : f32
    %14 = vector.broadcast %cst_10 : f32 to vector<128x128xf32>
    %15 = arith.maximumf %13, %14 : vector<128x128xf32>
    %16 = vector.shape_cast %15 : vector<128x128xf32> to vector<8x16x128xf32>
    %cst_11 = arith.constant dense<0xFF800000> : vector<8x128xf32>
    %17 = vector.multi_reduction <maximumf>, %16, %cst_11 [1] : vector<8x16x128xf32> to vector<8x128xf32>
    %c0_12 = arith.constant 0 : index
    %c0_13 = arith.constant 0 : index
    %18 = vector.load %arg5[%c0_12, %c0_13] : memref<8x128xf32, #tpu.memory_space<vmem>>, vector<8x128xf32>
    tpu.vector_store %arg5[%c0_12, %c0_13], %17 {strides = array<i32>} : memref<8x128xf32, #tpu.memory_space<vmem>>, vector<8x128xf32>,
    return
  }
  func.func @transform_0(%arg0: i32) -> (i32, i32) {
    %c0_i32 = arith.constant 0 : i32
    %c0_i32_0 = arith.constant 0 : i32
    return %arg0, %c0_i32 : i32, i32
  }
  func.func @transform_1(%arg0: i32) -> (i32, i32) {
    %c0_i32 = arith.constant 0 : i32
    %c0_i32_0 = arith.constant 0 : i32
    %c0_i32_1 = arith.constant 0 : i32
    return %c0_i32, %c0_i32_0 : i32, i32
  }
  func.func @transform_2(%arg0: i32) -> (i32, i32) {
    %c0_i32 = arith.constant 0 : i32
    %c0_i32_0 = arith.constant 0 : i32
    %c0_i32_1 = arith.constant 0 : i32
    return %c0_i32, %c0_i32_0 : i32, i32
  }
  func.func @transform_3(%arg0: i32) -> (i32, i32) {
    %c0_i32 = arith.constant 0 : i32
    %c0_i32_0 = arith.constant 0 : i32
    %c0_i32_1 = arith.constant 0 : i32
    return %c0_i32, %c0_i32_0 : i32, i32
  }
  func.func @transform_4(%arg0: i32) -> (i32, i32) {
    %c0_i32 = arith.constant 0 : i32
    %c0_i32_0 = arith.constant 0 : i32
    return %arg0, %c0_i32 : i32, i32
  }
}

module attributes {stable_mosaic.version = 11 : i64} {
  func.func @local_op_kernel(%arg0: i32, %arg1: memref<128x32xbf16, #tpu.memory_space<vmem>>, %arg2: memref<32x128xbf16, #tpu.memory_space<vmem>>, %arg3: memref<128x128xbf16, #tpu.memory_space<vmem>>, %arg4: memref<2x128xf32, #tpu.memory_space<vmem>>, %arg5: memref<8x128xf32, #tpu.memory_space<vmem>>) attributes {dimension_semantics = [#tpu.dimension_semantics<parallel>], iteration_bounds = array<i64: 2>, scalar_prefetch = 0 : i64, scratch_operands = 0 : i64, tpu.core_type = #tpu.core_type<tc>, window_params = [{transform_indices = @transform_0, window_bounds = array<i64: 128, 32>}, {pipeline_mode = #tpu.pipeline_mode<synchronous>, transform_indices = @transform_1, window_bounds = array<i64: 32, 128>}, {pipeline_mode = #tpu.pipeline_mode<synchronous>, transform_indices = @transform_2, window_bounds = array<i64: 128, 128>}, {pipeline_mode = #tpu.pipeline_mode<synchronous>, transform_indices = @transform_3, window_bounds = array<i64: 2, 128>}, {transform_indices = @transform_4, window_bounds = array<i64: 8, 128>}]} {
    %c0 = arith.constant 0 : index
    %c0_0 = arith.constant 0 : index
    %0 = vector.load %arg1[%c0, %c0_0] : memref<128x32xbf16, #tpu.memory_space<vmem>>, vector<128x32xbf16>
    %c0_1 = arith.constant 0 : index
    %c0_2 = arith.constant 0 : index
    %1 = vector.load %arg2[%c0_1, %c0_2] : memref<32x128xbf16, #tpu.memory_space<vmem>>, vector<32x128xbf16>
    %cst = arith.constant dense<0.000000e+00> : vector<128x128xf32>
    %2 = tpu.matmul %0, %1, %cst {dimension_numbers = #tpu.dot_dimension_numbers<[1], [0], [0], [1], [0, 0, 1, 1], [], []>} : vector<128x32xbf16>, vector<32x128xbf16>, vector<128x128xf32> -> vector<128x128xf32>
    %c0_3 = arith.constant 0 : index
    %c0_4 = arith.constant 0 : index
    %3 = vector.load %arg4[%c0_3, %c0_4] : memref<2x128xf32, #tpu.memory_space<vmem>>, vector<1x128xf32>
    %4 = vector.broadcast %3 : vector<1x128xf32> to vector<128x128xf32>
    %5 = arith.addf %2, %4 : vector<128x128xf32>
    %cst_5 = arith.constant 0.000000e+00 : f32
    %6 = vector.broadcast %cst_5 : f32 to vector<128x128xf32>
    %7 = arith.maximumf %5, %6 : vector<128x128xf32>
    %8 = arith.truncf %7 : vector<128x128xf32> to vector<128x128xbf16>
    %c0_6 = arith.constant 0 : index
    %c0_7 = arith.constant 0 : index
    %9 = vector.load %arg3[%c0_6, %c0_7] : memref<128x128xbf16, #tpu.memory_space<vmem>>, vector<128x128xbf16>
    %cst_8 = arith.constant dense<0.000000e+00> : vector<128x128xf32>
    %10 = tpu.matmul %8, %9, %cst_8 {dimension_numbers = #tpu.dot_dimension_numbers<[1], [0], [0], [1], [0, 0, 1, 1], [], []>} : vector<128x128xbf16>, vector<128x128xbf16>, vector<128x128xf32> -> vector<128x128xf32>
    %c1 = arith.constant 1 : index
    %c0_9 = arith.constant 0 : index
    %11 = vector.load %arg4[%c1, %c0_9] : memref<2x128xf32, #tpu.memory_space<vmem>>, vector<1x128xf32>
    %12 = vector.broadcast %11 : vector<1x128xf32> to vector<128x128xf32>
    %13 = arith.addf %10, %12 : vector<128x128xf32>
    %cst_10 = arith.constant 0.000000e+00 : f32
    %14 = vector.broadcast %cst_10 : f32 to vector<128x128xf32>
    %15 = arith.maximumf %13, %14 : vector<128x128xf32>
    %16 = vector.shape_cast %15 : vector<128x128xf32> to vector<8x16x128xf32>
    %cst_11 = arith.constant dense<0xFF800000> : vector<8x128xf32>
    %17 = vector.multi_reduction <maximumf>, %16, %cst_11 [1] : vector<8x16x128xf32> to vector<8x128xf32>
    %c0_12 = arith.constant 0 : index
    %c0_13 = arith.constant 0 : index
    %18 = vector.load %arg5[%c0_12, %c0_13] : memref<8x128xf32, #tpu.memory_space<vmem>>, vector<8x128xf32>
    tpu.vector_store %arg5[%c0_12, %c0_13], %17 {strides = array<i32>} : memref<8x128xf32, #tpu.memory_space<vmem>>, vector<8x128xf32>,
    return
  }
  func.func @transform_0(%arg0: i32) -> (i32, i32) {
    %c0_i32 = arith.constant 0 : i32
    %c0_i32_0 = arith.constant 0 : i32
    return %arg0, %c0_i32 : i32, i32
  }
  func.func @transform_1(%arg0: i32) -> (i32, i32) {
    %c0_i32 = arith.constant 0 : i32
    %c0_i32_0 = arith.constant 0 : i32
    %c0_i32_1 = arith.constant 0 : i32
    return %c0_i32, %c0_i32_0 : i32, i32
  }
  func.func @transform_2(%arg0: i32) -> (i32, i32) {
    %c0_i32 = arith.constant 0 : i32
    %c0_i32_0 = arith.constant 0 : i32
    %c0_i32_1 = arith.constant 0 : i32
    return %c0_i32, %c0_i32_0 : i32, i32
  }
  func.func @transform_3(%arg0: i32) -> (i32, i32) {
    %c0_i32 = arith.constant 0 : i32
    %c0_i32_0 = arith.constant 0 : i32
    %c0_i32_1 = arith.constant 0 : i32
    return %c0_i32, %c0_i32_0 : i32, i32
  }
  func.func @transform_4(%arg0: i32) -> (i32, i32) {
    %c0_i32 = arith.constant 0 : i32
    %c0_i32_0 = arith.constant 0 : i32
    return %arg0, %c0_i32 : i32, i32
  }
}

</mosaic_0001>

<bundles_post_ra>
// kernel: tpu_custom_call.1
= control target key start
LH: loop header
LB: loop body
LE: loop exit
PB: predicated region body
PF: predicated region fallthrough
CT: control target
= control target key end

     0   :  { %9 = vsyncpa [#allocation3], 0  ;;  %s1208_s0 = inlined_call_operand.vmem [shape: bf16[256,32], index: 0, kind: input, shape index: {}]   ;;  %s1209_s1 = inlined_call_operand.vmem [shape: bf16[32,128], index: 1, kind: input, shape index: {}]   ;;  %s1210_s2 = inlined_call_operand.vmem [shape: bf16[128,128], index: 2, kind: input, shape index: {}]   ;;  %s1211_s3 = inlined_call_operand.vmem [shape: f32[2,128], index: 3, kind: input, shape index: {}]   ;;  %s1212_s4 = inlined_call_operand.hbm [shape: f32[16,128], index: 4, kind: output, shape index: {}]  }
   0x1   :  { %11 = vsyncpa [#allocation3 + $0x1], 0  ;;  %s1037_s15 = smov 0   ;;  %s1039_s16 = smov 0  }
   0x2   :  { %s1041_s17 = smov 0   ;;  %s1043_s18 = smov 0  }
   0x3 LB: > { %s1058_s19 = sadd.s32 4294967295, %s1009_s18   ;;  %s757_s20 = sadd.s32 4294967294, %s1009_s18   ;;  %s1009_s18 = sphi %s1043_s18, %s1218_s18   ;;  %s1005_s17 = sphi %s1041_s17, %s1217_s17   ;;  %s1001_s16 = sphi %s1039_s16, %s1216_s16   ;;  %s997_s15 = sphi %s1037_s15, %s1215_s15  }
   0x4   : > { %s1062_s21 = sadd.s32 1, %s1009_s18   ;;  %s113_s22 = sadd.s32 1, %s1005_s17 }
   0x5   : > { %s110_s23 = ssub.s32 %s1009_s18, %s1062_s21  ;;  %p123_p0 = scmp.ne.s32.totalorder %s1005_s17, %s1001_s16 }
   0x6   : > { %p111_p1 = scmp.eq.s32.totalorder %s110_s23, 0  ;;  %p124_p2 = scmp.eq.s32.totalorder %s1058_s19, 1 }
   0x7   : > { %p129_p3 = scmp.ne.s32.totalorder %s1001_s16, %s997_s15  ;;  %p130_p4 = scmp.eq.s32.totalorder %s757_s20, 1 }
   0x8   : > { %s1073_s24 = scalar_select %p111_p1, %s1005_s17, %s113_s22  }
   0x9   : > { %p1075_p5 = por %p124_p2, %p123_p0  ;;  %p1079_p6 = por %p130_p4, %p129_p3 }
   0xa   : > { %p760_p7 = scmp.ge.s32.totalorder %s1009_s18, 1  ;;  %p166_p8 = scmp.lt.s32.totalorder %s1009_s18, 3 }
   0xc   : > { %p167_p9 = pnand %p760_p7, %p166_p8 }
   0xd   : > { %v929_v0 = vld [vmem:[%s1209_s1] sm:$0xff] (!%p167_p9)   ;;  %s762_s29 = sshll.u32 (!%p167_p9), %s1058_s19, 4  ;;  %v930_v1 = vld [vmem:[%s1209_s1 + $0x8] sm:$0xff] (!%p167_p9)   ;;  %vm276_vm0 = vcmask (!%p167_p9), 261120   ;;  %v941_v4 = vld [vmem:[%s1210_s2 + $0x10] sm:$0xff] (!%p167_p9)   ;;  %vm668_vm1 = vcmask (!%p167_p9), 1041409  }
   0xe   : > { %170 = sbr.rel (%p167_p9) target bundleno = 521 (0x209), region = 36  ;;  %p193_p10 = scmp.lt.s32.totalorder (!%p167_p9), %s762_s29, 31  ;;  %822 = vmatprep.subr.bf16.mxu0 (!%p167_p9), %v929_v0  ;;  %v939_v2 = vld [vmem:[%s1210_s2] sm:$0xff] (!%p167_p9)   ;;  %v940_v3 = vld [vmem:[%s1210_s2 + $0x8] sm:$0xff] (!%p167_p9)   ;;  %v942_v8 = vld [vmem:[%s1210_s2 + $0x18] sm:$0xff] (!%p167_p9)   ;;  %vm670_vm2 = vcmask (!%p167_p9), 1042434  }
   0xf   : > { %823 = vmatpush3.bf16.msra.mxu0 (!%p167_p9), %v929_v0  ;;  %874 = vmatprep.subr.bf16.mxu1 (!%p167_p9), %v939_v2  ;;  %v943_v10 = vld [vmem:[%s1210_s2 + $0x20] sm:$0xff] (!%p167_p9)   ;;  %v944_v12 = vld [vmem:[%s1210_s2 + $0x28] sm:$0xff] (!%p167_p9)   ;;  %v945_v16 = vld [vmem:[%s1210_s2 + $0x30] sm:$0xff] (!%p167_p9)   ;;  %vm672_vm3 = vcmask (!%p167_p9), 1043459   ;;  %vm674_vm4 = vcmask (!%p167_p9), 1044484   ;;  %vm676_vm5 = vcmask (!%p167_p9), 1045509  }
  0x10   : > { %824 = vmatprep.subr.bf16.mxu0 (!%p167_p9), %v930_v1  ;;  %882 = vmatpush3.bf16.msra.mxu1 (!%p167_p9), %v939_v2  ;;  %v946_v17 = vld [vmem:[%s1210_s2 + $0x38] sm:$0xff] (!%p167_p9)   ;;  %v764_v18 = vld [vmem:[%s1211_s3] ss:$0 sm:$0xff] (!%p167_p9)  ;;  %vm678_vm6 = vcmask (!%p167_p9), 1046534   ;;  %s793_s20 = sshll.u32 (!%p167_p9), %s1058_s19, 7  ;;  %vm680_vm7 = vcmask (!%p167_p9), 1047559  }
  0x11   : > { %875 = vmatprep.subr.bf16.mxu1 (!%p167_p9), %v940_v3  ;;  %s1011_s5 = smov (!%p167_p9), [#allocation2]  }
  0x12   : > { %s951_s6 = sshll.u32 (!%p167_p9), %s1011_s5, 4  ;;  %s952_s6 = int_to_ptr.vmem [resolvable:$false] %s951_s6 }
  0x13   : > { %825 = vmatpush3.bf16.msra.mxu0 (!%p167_p9), %v930_v1  ;;  %s953_s7 = scalar_lea.vmem (!%p167_p9), %s952_s6, 256 }
  0x14   : > { %842 = vmatprep.subr.bf16.mxu0 (!%p167_p9), %v939_v2  ;;  %883 = vmatpush3.bf16.msra.mxu1 (!%p167_p9), %v940_v3 }
  0x15   : > { %s1220_s29 = smov (!%p193_p10, %s762_s29), 31  ;;  %876 = vmatprep.subr.bf16.mxu1 %v941_v4 }
  0x16   : > { %s763_s10 = sshll.u32 %s1220_s29, 2  ;;  %s1166_s29 = scalar_lea.hbm %s1212_s4, %s793_s20 }
  0x17   : > { %s1101_s13 = scalar_lea.vmem %s1208_s0, %s763_s10 }
  0x18   : > { %v931_v5 = vld [vmem:[%s1101_s13] sm:$0xff]   ;;  %v932_v6 = vld [vmem:[%s1101_s13 + $0x8] sm:$0xff]   ;;  %v933_v7 = vld [vmem:[%s1101_s13 + $0x10] sm:$0xff]   ;;  %884 = vmatpush3.bf16.msra.mxu1 %v941_v4 }
  0x19   : > { %826 = vmatprep.mubr.msk.bf16.mxu0 %vm276_vm0, %v931_v5  ;;  %v934_v9 = vld [vmem:[%s1101_s13 + $0x18] sm:$0xff]   ;;  %877 = vmatprep.subr.bf16.mxu1 %v942_v8  ;;  %v935_v11 = vld [vmem:[%s1101_s13 + $0x20] sm:$0xff]   ;;  %v936_v13 = vld [vmem:[%s1101_s13 + $0x28] sm:$0xff]  }
  0x1a   : > { %827 = vmatmul.mubr.msk.bf16.vlgmr.msra.gmra.mrb[0].mxu0 %vm276_vm0, %v932_v6  ;;  %v937_v14 = vld [vmem:[%s1101_s13 + $0x30] sm:$0xff]   ;;  %v938_v15 = vld [vmem:[%s1101_s13 + $0x38] sm:$0xff]   ;;  %s189_s13 = sand.u32 1, %s1001_s16  }
  0x1b   : > { %830 = vmatprep.mubr.msk.bf16.mxu0 %vm276_vm0, %v933_v7  ;;  %843 = vmatpush3.bf16.msra.mxu0 %v939_v2  ;;  %s761_s14 = sshll.u32 %s189_s13, 3  ;;  %s685_s30 = scalar_lea.sflag [#allocation3], %s189_s13 }
  0x1c   : > { %844 = vmatprep.subr.bf16.mxu0 %v940_v3  ;;  %885 = vmatpush3.bf16.msra.mxu1 %v942_v8  ;;  %s191_s22 = scalar_lea.vmem [#allocation2], %s761_s14 }
  0x1d   : > { %878 = vmatprep.subr.bf16.mxu1 %v943_v10  ;;  %s698_s23 = sshll.u32 %s191_s22, 4  ;;  %s1168_s23 = int_to_ptr.vmem [resolvable:$true] %s698_s23 }
  0x1e   : > { %s947_s19 = scalar_lea.vmem %s1168_s23, 128  ;;  %p954_p0 = scmp.lt.s32.totalorder %s1168_s23, %s952_s6 }
  0x1f   : > { %845 = vmatpush3.bf16.msra.mxu0 %v940_v3  ;;  %p948_p11 = scmp.ne.s32.totalorder %s1168_s23, %s947_s19  ;;  %p955_p1 = scmp.lt.s32.totalorder %s953_s7, %s947_s19 }
  0x20   : > { %846 = vmatprep.subr.bf16.mxu0 %v941_v4  ;;  %886 = vmatpush3.bf16.msra.mxu1 %v943_v10 }
  0x21   : > { %879 = vmatprep.subr.bf16.mxu1 %v944_v12  ;;  %p949_p12 = pnand %p948_p11, %p1075_p5  ;;  %p956_p2 = por %p955_p1, %p954_p0 }
  0x22   : > { %831 = vmatmul.mubr.msk.bf16.gmra.mrb[4].mxu0 %vm276_vm0, %v934_v9 }
  0x23   : > { %834 = vmatprep.mubr.msk.bf16.mxu0 %vm276_vm0, %v935_v11  ;;  %847 = vmatpush3.bf16.msra.mxu0 %v941_v4  ;;  %v1143_v11 = vld [vmem:[%s1211_s3 + $0x1] ss:$0 sm:$0xff]  ;;  %p950_p13 = pneg %p949_p12 }
  0x24   : > { %848 = vmatprep.subr.bf16.mxu0 %v942_v8  ;;  %887 = vmatpush3.bf16.msra.mxu1 %v944_v12 }
  0x25   : > { %880 = vmatprep.subr.bf16.mxu1 %v945_v16  ;;  %p957_p3 = pnand %p956_p2, %p950_p13 }
  0x27   : > { %849 = vmatpush3.bf16.msra.mxu0 %v942_v8 }
  0x28   : > { %850 = vmatprep.subr.bf16.mxu0 %v943_v10  ;;  %888 = vmatpush3.bf16.msra.mxu1 %v945_v16 }
  0x29   : > { %881 = vmatprep.subr.bf16.mxu1 %v946_v17 }
  0x2a   : > { %835 = vmatmul.mubr.msk.bf16.gmra.mrb[8].mxu0 %vm276_vm0, %v936_v13 }
  0x2b   : > { %838 = vmatprep.mubr.msk.bf16.mxu0 %vm276_vm0, %v937_v14  ;;  %851 = vmatpush3.bf16.msra.mxu0 %v943_v10 }
  0x2c   : > { %852 = vmatprep.subr.bf16.mxu0 %v944_v12  ;;  %889 = vmatpush3.bf16.msra.mxu1 %v946_v17 }
  0x2f   : > { %853 = vmatpush3.bf16.msra.mxu0 %v944_v12 }
  0x30   : > { %854 = vmatprep.subr.bf16.mxu0 %v945_v16 }
  0x32   : > { %839 = vmatmul.mubr.msk.bf16.gmra.mrb[12].mxu0 %vm276_vm0, %v938_v15 }
  0x33   : > { %855 = vmatpush3.bf16.msra.mxu0 %v945_v16 }
  0x34   : > { %856 = vmatprep.subr.bf16.mxu0 %v946_v17 }
  0x37   : > { %857 = vmatpush3.bf16.msra.mxu0 %v946_v17 }
  0xed   : > { %v828_v19 = vpop.f32.mrb[0].mxu0 }
  0xee   : > { %v344_v20 = vadd.f32 %v828_v19, %v764_v18  ;;  %v335_v21 = vpop.f32.mrb[1].mxu0 }
  0xef   : > { %v336_v22 = vadd.f32 %v764_v18, %v335_v21  ;;  %v829_v23 = vpop.f32.mrb[2].mxu0 }
  0xf0   : > { %v347_v24 = vadd.f32 %v829_v23, %v764_v18  ;;  %v338_v25 = vpop.f32.mrb[3].mxu0  ;;  %v400_v27 = vmax.f32 %v344_v20, 0.0 }
  0xf1   : > { %v339_v26 = vadd.f32 %v764_v18, %v338_v25  ;;  %v398_v29 = vmax.f32 %v336_v22, 0.0 }
  0xf2   : > { %v401_v28 = vmax.f32 %v347_v24, 0.0 }
  0xf3   : > { %v399_v30 = vmax.f32 %v339_v26, 0.0 }
  0xf4   : > { %v415_v31 = vpack.c.bf16 %v401_v28, %v400_v27 }
  0xf5   : > { %v414_v32 = vpack.c.bf16 %v399_v30, %v398_v29  ;;  %v832_v33 = vpop.f32.mrb[4].mxu0 }
  0xf6   : > { %v360_v34 = vadd.f32 %v832_v33, %v764_v18  ;;  %v351_v35 = vpop.f32.mrb[5].mxu0 }
  0xf7   : > { %v352_v36 = vadd.f32 %v764_v18, %v351_v35  ;;  %v833_v37 = vpop.f32.mrb[6].mxu0  ;;  %858 = vmatprep.mubr.bf16.mxu0 %v414_v32 }
  0xf8   : > { %v363_v38 = vadd.f32 %v833_v37, %v764_v18  ;;  %v354_v39 = vpop.f32.mrb[7].mxu0  ;;  %859 = vmatmul.mubr.bf16.vlgmr.msra.gmra.mrb[16].mxu0 %v415_v31  ;;  %v404_v41 = vmax.f32 %v360_v34, 0.0 }
  0xf9   : > { %v355_v40 = vadd.f32 %v764_v18, %v354_v39  ;;  %v402_v43 = vmax.f32 %v352_v36, 0.0 }
  0xfa   : > { %v405_v42 = vmax.f32 %v363_v38, 0.0 }
  0xfb   : > { %v403_v44 = vmax.f32 %v355_v40, 0.0 }
  0xfc   : > { %v417_v45 = vpack.c.bf16 %v405_v42, %v404_v41 }
  0xfd   : > { %v836_v46 = vpop.f32.mrb[8].mxu0  ;;  %v416_v47 = vpack.c.bf16 %v403_v44, %v402_v43 }
  0xfe   : > { %v376_v48 = vadd.f32 %v836_v46, %v764_v18  ;;  %v367_v49 = vpop.f32.mrb[9].mxu0 }
  0xff   : > { %v368_v50 = vadd.f32 %v764_v18, %v367_v49  ;;  %v837_v51 = vpop.f32.mrb[10].mxu0  ;;  %862 = vmatprep.mubr.bf16.mxu1 %v416_v47 }
 0x100   : > { %v379_v52 = vadd.f32 %v837_v51, %v764_v18  ;;  %v370_v53 = vpop.f32.mrb[11].mxu0  ;;  %863 = vmatmul.mubr.bf16.vlgmr.msra.gmra.mrb[0].mxu1 %v417_v45  ;;  %v408_v55 = vmax.f32 %v376_v48, 0.0 }
 0x101   : > { %v371_v54 = vadd.f32 %v764_v18, %v370_v53  ;;  %v406_v57 = vmax.f32 %v368_v50, 0.0 }
 0x102   : > { %v409_v56 = vmax.f32 %v379_v52, 0.0 }
 0x103   : > { %v407_v58 = vmax.f32 %v371_v54, 0.0 }
 0x104   : > { %v419_v59 = vpack.c.bf16 %v409_v56, %v408_v55 }
 0x105   : > { %v418_v60 = vpack.c.bf16 %v407_v58, %v406_v57  ;;  %v840_v61 = vpop.f32.mrb[12].mxu0 }
 0x106   : > { %v392_v62 = vadd.f32 %v840_v61, %v764_v18  ;;  %v383_v63 = vpop.f32.mrb[13].mxu0 }
 0x107   : > { %v384_v0 = vadd.f32 %v764_v18, %v383_v63  ;;  %v841_v1 = vpop.f32.mrb[14].mxu0  ;;  %866 = vmatprep.mubr.bf16.mxu1 %v418_v60 }
 0x108   : > { %v395_v2 = vadd.f32 %v841_v1, %v764_v18  ;;  %v386_v3 = vpop.f32.mrb[15].mxu0  ;;  %867 = vmatmul.mubr.bf16.gmra.mrb[4].mxu1 %v419_v59  ;;  %v412_v5 = vmax.f32 %v392_v62, 0.0 }
 0x109   : > { %v387_v4 = vadd.f32 %v764_v18, %v386_v3  ;;  %v410_v7 = vmax.f32 %v384_v0, 0.0 }
 0x10a   : > { %v413_v6 = vmax.f32 %v395_v2, 0.0 }
 0x10b   : > { %v411_v8 = vmax.f32 %v387_v4, 0.0 }
 0x10c   : > { %v421_v9 = vpack.c.bf16 %v413_v6, %v412_v5 }
 0x10d   : > { %v420_v10 = vpack.c.bf16 %v411_v8, %v410_v7 }
 0x10f   : > { %870 = vmatprep.mubr.bf16.mxu1 %v420_v10 }
 0x110   : > { %871 = vmatmul.mubr.bf16.gmra.mrb[8].mxu1 %v421_v9 }
 0x1cb   : > { %v860_v12 = vpop.f32.mrb[16].mxu0 }
 0x1cc   : > { %v534_v13 = vadd.f32 %v860_v12, %v1143_v11  ;;  %v525_v14 = vpop.f32.mrb[17].mxu0 }
 0x1cd   : > { %v526_v15 = vadd.f32 %v1143_v11, %v525_v14  ;;  %v861_v16 = vpop.f32.mrb[18].mxu0 }
 0x1ce   : > { %v537_v17 = vadd.f32 %v861_v16, %v1143_v11  ;;  %v528_v18 = vpop.f32.mrb[19].mxu0  ;;  %v590_v20 = vmax.f32 %v534_v13, 0.0 }
 0x1cf   : > { %v529_v19 = vadd.f32 %v1143_v11, %v528_v18  ;;  %v588_v22 = vmax.f32 %v526_v15, 0.0 }
 0x1d0   : > { %v591_v21 = vmax.f32 %v537_v17, 0.0 }
 0x1d1   : > { %v589_v23 = vmax.f32 %v529_v19, 0.0 }
 0x1d2   : > { %v611_v24 = vmax.f32 %v590_v20, %v591_v21 }
 0x1d3   : > { %v604_v25 = vmax.f32 %v588_v22, %v589_v23  ;;  %v864_v26 = vpop.f32.mrb[0].mxu1 }
 0x1d4   : > { %v612_v27 = vrot.slane %v611_v24, 4  ;;  %v550_v28 = vadd.f32 %v864_v26, %v1143_v11  ;;  %v541_v29 = vpop.f32.mrb[1].mxu1 }
 0x1d5   : > { %v605_v30 = vrot.slane %v604_v25, 4  ;;  %v542_v31 = vadd.f32 %v1143_v11, %v541_v29  ;;  %v865_v32 = vpop.f32.mrb[2].mxu1 }
 0x1d6   : > { %v613_v33 = vmax.f32 %v611_v24, %v612_v27  ;;  %v553_v34 = vadd.f32 %v865_v32, %v1143_v11  ;;  %v544_v35 = vpop.f32.mrb[3].mxu1  ;;  %v594_v39 = vmax.f32 %v550_v28, 0.0 }
 0x1d7   : > { %v606_v36 = vmax.f32 %v604_v25, %v605_v30  ;;  %v545_v37 = vadd.f32 %v1143_v11, %v544_v35  ;;  %v592_v42 = vmax.f32 %v542_v31, 0.0 }
 0x1d8   : > { %v614_v38 = vrot.slane %v613_v33, 2  ;;  %v595_v40 = vmax.f32 %v553_v34, 0.0 }
 0x1d9   : > { %v607_v41 = vrot.slane %v606_v36, 2  ;;  %v593_v43 = vmax.f32 %v545_v37, 0.0 }
 0x1da   : > { %v615_v44 = vmax.f32 %v613_v33, %v614_v38  ;;  %v625_v45 = vmax.f32 %v594_v39, %v595_v40 }
 0x1db   : > { %v608_v46 = vmax.f32 %v606_v36, %v607_v41  ;;  %v618_v47 = vmax.f32 %v592_v42, %v593_v43  ;;  %v868_v48 = vpop.f32.mrb[4].mxu1 }
 0x1dc   : > { %v616_v49 = vrot.slane %v615_v44, 1  ;;  %v626_v50 = vrot.slane %v625_v45, 4  ;;  %v566_v51 = vadd.f32 %v868_v48, %v1143_v11  ;;  %v557_v52 = vpop.f32.mrb[5].mxu1 }
 0x1dd   : > { %v609_v53 = vrot.slane %v608_v46, 1  ;;  %v619_v54 = vrot.slane %v618_v47, 4  ;;  %v558_v55 = vadd.f32 %v1143_v11, %v557_v52  ;;  %v869_v56 = vpop.f32.mrb[6].mxu1 }
 0x1de   : > { %v617_v57 = vmax.f32 %v615_v44, %v616_v49  ;;  %v627_v58 = vmax.f32 %v625_v45, %v626_v50  ;;  %v569_v59 = vadd.f32 %v869_v56, %v1143_v11  ;;  %v560_v60 = vpop.f32.mrb[7].mxu1  ;;  %v598_v1 = vmax.f32 %v566_v51, 0.0 }
 0x1df   : > { %v610_v61 = vmax.f32 %v608_v46, %v609_v53  ;;  %v620_v62 = vmax.f32 %v618_v47, %v619_v54  ;;  %v561_v63 = vadd.f32 %v1143_v11, %v560_v60  ;;  %v596_v5 = vmax.f32 %v558_v55, 0.0 }
 0x1e0   : > { %v628_v0 = vrot.slane %v627_v58, 2  ;;  %v599_v2 = vmax.f32 %v569_v59, 0.0 }
 0x1e1   : > { %v669_v3 = vsel %vm668_vm1, %v617_v57, %v610_v61  ;;  %v621_v4 = vrot.slane %v620_v62, 2  ;;  %v597_v6 = vmax.f32 %v561_v63, 0.0 }
 0x1e2   : > { %v629_v7 = vmax.f32 %v627_v58, %v628_v0  ;;  %v639_v8 = vmax.f32 %v598_v1, %v599_v2 }
 0x1e3   : > { %v622_v9 = vmax.f32 %v620_v62, %v621_v4  ;;  %v632_v10 = vmax.f32 %v596_v5, %v597_v6  ;;  %v872_v12 = vpop.f32.mrb[8].mxu1 }
 0x1e4   : > { %v630_v13 = vrot.slane %v629_v7, 1  ;;  %v640_v14 = vrot.slane %v639_v8, 4  ;;  %v582_v15 = vadd.f32 %v872_v12, %v1143_v11  ;;  %v573_v16 = vpop.f32.mrb[9].mxu1 }
 0x1e5   : > { %v623_v17 = vrot.slane %v622_v9, 1  ;;  %v633_v18 = vrot.slane %v632_v10, 4  ;;  %v574_v19 = vadd.f32 %v1143_v11, %v573_v16  ;;  %v873_v20 = vpop.f32.mrb[10].mxu1 }
 0x1e6   : > { %v641_v21 = vmax.f32 %v639_v8, %v640_v14  ;;  %v585_v22 = vadd.f32 %v873_v20, %v1143_v11  ;;  %v576_v23 = vpop.f32.mrb[11].mxu1  ;;  %v631_v27 = vmax.f32 %v629_v7, %v630_v13  ;;  %v602_v29 = vmax.f32 %v582_v15, 0.0 }
 0x1e7   : > { %v624_v24 = vmax.f32 %v622_v9, %v623_v17  ;;  %v634_v25 = vmax.f32 %v632_v10, %v633_v18  ;;  %v577_v26 = vadd.f32 %v1143_v11, %v576_v23  ;;  %v600_v33 = vmax.f32 %v574_v19, 0.0 }
 0x1e8   : > { %v642_v28 = vrot.slane %v641_v21, 2  ;;  %v603_v30 = vmax.f32 %v585_v22, 0.0 }
 0x1e9   : > { %v671_v31 = vsel %vm670_vm2, %v624_v24, %v669_v3  ;;  %v635_v32 = vrot.slane %v634_v25, 2  ;;  %v601_v34 = vmax.f32 %v577_v26, 0.0 }
 0x1ea   : > { %v643_v35 = vmax.f32 %v641_v21, %v642_v28  ;;  %v653_v36 = vmax.f32 %v602_v29, %v603_v30  ;;  %v673_v37 = vsel %vm672_vm3, %v631_v27, %v671_v31 }
 0x1eb   : > { %v636_v38 = vmax.f32 %v634_v25, %v635_v32  ;;  %v646_v39 = vmax.f32 %v600_v33, %v601_v34 }
 0x1ec   : > { %v644_v40 = vrot.slane %v643_v35, 1  ;;  %v654_v41 = vrot.slane %v653_v36, 4 }
 0x1ed   : > { %v637_v42 = vrot.slane %v636_v38, 1  ;;  %v647_v43 = vrot.slane %v646_v39, 4 }
 0x1ee   : > { %v655_v11 = vmax.f32 %v653_v36, %v654_v41  ;;  %v645_v46 = vmax.f32 %v643_v35, %v644_v40 }
 0x1ef   : > { %v638_v44 = vmax.f32 %v636_v38, %v637_v42  ;;  %v648_v45 = vmax.f32 %v646_v39, %v647_v43 }
 0x1f0   : > { %v656_v47 = vrot.slane %v655_v11, 2 }
 0x1f1   : > { %v649_v48 = vrot.slane %v648_v45, 2  ;;  %v675_v49 = vsel %vm674_vm4, %v638_v44, %v673_v37 }
 0x1f2   : > { %v657_v50 = vmax.f32 %v655_v11, %v656_v47  ;;  %v677_v51 = vsel %vm676_vm5, %v645_v46, %v675_v49 }
 0x1f3   : > { %v650_v52 = vmax.f32 %v648_v45, %v649_v48 }
 0x1f4   : > { %v658_v53 = vrot.slane %v657_v50, 1 }
 0x1f5   : > { %v651_v54 = vrot.slane %v650_v52, 1 }
 0x1f6   : > { %v659_v56 = vmax.f32 %v657_v50, %v658_v53 }
 0x1f7   : > { %v652_v55 = vmax.f32 %v650_v52, %v651_v54 }
 0x1f9   : > { %v679_v57 = vsel %vm678_vm6, %v652_v55, %v677_v51 }
 0x1fa   : > { %v681_v58 = vsel %vm680_vm7, %v659_v56, %v679_v57 }
 0x1fb   : > { %683 = vst [vmem:[%s191_s22] sm:$0xff] %v681_v58 }
 0x1fc   : > { %960 = shalt.err (!%p957_p3)
}
 0x1fd   : > { %s961_s8 = scalar_lea.hbm %s1166_s29, 128  ;;  %s965_s11 = scalar_lea.hbm %s1212_s4, 256 }
 0x1fe   : > { %p962_p4 = scmp.ne.s32.totalorder %s1166_s29, %s961_s8  ;;  %p966_p9 = scmp.lt.u32.totalorder %s1166_s29, %s1212_s4 }
 0x1ff   : > { %p967_p10 = scmp.lt.u32.totalorder %s965_s11, %s961_s8  ;;  %p969_p12 = scmp.lt.u32.totalorder %s961_s8, %s1166_s29 }
 0x200   : > { %p963_p7 = pnand %p962_p4, %p1075_p5 }
 0x201   : > { %p968_p11 = por %p967_p10, %p966_p9 }
 0x202   : > { %p964_p8 = pneg %p963_p7 }
 0x203   : > { %p970_p13 = por %p969_p12, %p968_p11 }
 0x205   : > { %p971_p0 = pnand %p970_p13, %p964_p8 }
 0x207   : > { %974 = shalt.err (!%p971_p0)
}
 0x208   : > { %890 = dma.vmem_to_hbm [thread:$0]  (%p1075_p5), %s1168_s23, 128, %s1166_s29, %s685_s30  }
 0x209 PF: > { %p896_p1 = scmp.ge.s32.totalorder %s1009_s18, 2  ;;  %s710_s14 = sand.u32 1, %s997_s15  }
 0x20a   : > { %s711_s20 = scalar_lea.sflag [#allocation3], %s710_s14 }
 0x20b   : > { %p893_p2 = pnand %p896_p1, %p1079_p6 }
 0x20d   : > { %992 = dma.done.wait (!%p893_p2), %s711_s20, 128  }
 0x20e   : > { %994 = vsyncadd (!%p893_p2), %s711_s20, 4294967168  ;;  %p14_p3 = scmp.ge.s32.totalorder %s1062_s21, 4   ;;  %s1215_s15 = smov %s1001_s16 }
 0x20f   : > { %s1216_s16 = smov %s1005_s17  ;;  %s1217_s17 = smov %s1073_s24 }
 0x210   : > { %s1218_s18 = smov %s1062_s21  ;;  %16 = sbr.rel (!%p14_p3) target bundleno = 3 (0x3), region = 71 }
 0x217   :  { %716 = vsyncpa [#allocation3], 1 }
 0x218   :  { %718 = vsyncpa [#allocation3 + $0x1], 1 }

// kernel: tpu_custom_call.1
= control target key start
LH: loop header
LB: loop body
LE: loop exit
PB: predicated region body
PF: predicated region fallthrough
CT: control target
= control target key end

     0   :  { %9 = vsyncpa [#allocation3], 0  ;;  %s1208_s0 = inlined_call_operand.vmem [shape: bf16[256,32], index: 0, kind: input, shape index: {}]   ;;  %s1209_s1 = inlined_call_operand.vmem [shape: bf16[32,128], index: 1, kind: input, shape index: {}]   ;;  %s1210_s2 = inlined_call_operand.vmem [shape: bf16[128,128], index: 2, kind: input, shape index: {}]   ;;  %s1211_s3 = inlined_call_operand.vmem [shape: f32[2,128], index: 3, kind: input, shape index: {}]   ;;  %s1212_s4 = inlined_call_operand.hbm [shape: f32[16,128], index: 4, kind: output, shape index: {}]  }
   0x1   :  { %11 = vsyncpa [#allocation3 + $0x1], 0  ;;  %s1037_s15 = smov 0   ;;  %s1039_s16 = smov 0  }
   0x2   :  { %s1041_s17 = smov 0   ;;  %s1043_s18 = smov 0  }
   0x3 LB: > { %s1058_s19 = sadd.s32 4294967295, %s1009_s18   ;;  %s757_s20 = sadd.s32 4294967294, %s1009_s18   ;;  %s1009_s18 = sphi %s1043_s18, %s1218_s18   ;;  %s1005_s17 = sphi %s1041_s17, %s1217_s17   ;;  %s1001_s16 = sphi %s1039_s16, %s1216_s16   ;;  %s997_s15 = sphi %s1037_s15, %s1215_s15  }
   0x4   : > { %s1062_s21 = sadd.s32 1, %s1009_s18   ;;  %s113_s22 = sadd.s32 1, %s1005_s17 }
   0x5   : > { %s110_s23 = ssub.s32 %s1009_s18, %s1062_s21  ;;  %p123_p0 = scmp.ne.s32.totalorder %s1005_s17, %s1001_s16 }
   0x6   : > { %p111_p1 = scmp.eq.s32.totalorder %s110_s23, 0  ;;  %p124_p2 = scmp.eq.s32.totalorder %s1058_s19, 1 }
   0x7   : > { %p129_p3 = scmp.ne.s32.totalorder %s1001_s16, %s997_s15  ;;  %p130_p4 = scmp.eq.s32.totalorder %s757_s20, 1 }
   0x8   : > { %s1073_s24 = scalar_select %p111_p1, %s1005_s17, %s113_s22  }
   0x9   : > { %p1075_p5 = por %p124_p2, %p123_p0  ;;  %p1079_p6 = por %p130_p4, %p129_p3 }
   0xa   : > { %p760_p7 = scmp.ge.s32.totalorder %s1009_s18, 1  ;;  %p166_p8 = scmp.lt.s32.totalorder %s1009_s18, 3 }
   0xc   : > { %p167_p9 = pnand %p760_p7, %p166_p8 }
   0xd   : > { %v929_v0 = vld [vmem:[%s1209_s1] sm:$0xff] (!%p167_p9)   ;;  %s762_s29 = sshll.u32 (!%p167_p9), %s1058_s19, 4  ;;  %v930_v1 = vld [vmem:[%s1209_s1 + $0x8] sm:$0xff] (!%p167_p9)   ;;  %vm276_vm0 = vcmask (!%p167_p9), 261120   ;;  %v941_v4 = vld [vmem:[%s1210_s2 + $0x10] sm:$0xff] (!%p167_p9)   ;;  %vm668_vm1 = vcmask (!%p167_p9), 1041409  }
   0xe   : > { %170 = sbr.rel (%p167_p9) target bundleno = 521 (0x209), region = 36  ;;  %p193_p10 = scmp.lt.s32.totalorder (!%p167_p9), %s762_s29, 31  ;;  %822 = vmatprep.subr.bf16.mxu0 (!%p167_p9), %v929_v0  ;;  %v939_v2 = vld [vmem:[%s1210_s2] sm:$0xff] (!%p167_p9)   ;;  %v940_v3 = vld [vmem:[%s1210_s2 + $0x8] sm:$0xff] (!%p167_p9)   ;;  %v942_v8 = vld [vmem:[%s1210_s2 + $0x18] sm:$0xff] (!%p167_p9)   ;;  %vm670_vm2 = vcmask (!%p167_p9), 1042434  }
   0xf   : > { %823 = vmatpush3.bf16.msra.mxu0 (!%p167_p9), %v929_v0  ;;  %874 = vmatprep.subr.bf16.mxu1 (!%p167_p9), %v939_v2  ;;  %v943_v10 = vld [vmem:[%s1210_s2 + $0x20] sm:$0xff] (!%p167_p9)   ;;  %v944_v12 = vld [vmem:[%s1210_s2 + $0x28] sm:$0xff] (!%p167_p9)   ;;  %v945_v16 = vld [vmem:[%s1210_s2 + $0x30] sm:$0xff] (!%p167_p9)   ;;  %vm672_vm3 = vcmask (!%p167_p9), 1043459   ;;  %vm674_vm4 = vcmask (!%p167_p9), 1044484   ;;  %vm676_vm5 = vcmask (!%p167_p9), 1045509  }
  0x10   : > { %824 = vmatprep.subr.bf16.mxu0 (!%p167_p9), %v930_v1  ;;  %882 = vmatpush3.bf16.msra.mxu1 (!%p167_p9), %v939_v2  ;;  %v946_v17 = vld [vmem:[%s1210_s2 + $0x38] sm:$0xff] (!%p167_p9)   ;;  %v764_v18 = vld [vmem:[%s1211_s3] ss:$0 sm:$0xff] (!%p167_p9)  ;;  %vm678_vm6 = vcmask (!%p167_p9), 1046534   ;;  %s793_s20 = sshll.u32 (!%p167_p9), %s1058_s19, 7  ;;  %vm680_vm7 = vcmask (!%p167_p9), 1047559  }
  0x11   : > { %875 = vmatprep.subr.bf16.mxu1 (!%p167_p9), %v940_v3  ;;  %s1011_s5 = smov (!%p167_p9), [#allocation2]  }
  0x12   : > { %s951_s6 = sshll.u32 (!%p167_p9), %s1011_s5, 4  ;;  %s952_s6 = int_to_ptr.vmem [resolvable:$false] %s951_s6 }
  0x13   : > { %825 = vmatpush3.bf16.msra.mxu0 (!%p167_p9), %v930_v1  ;;  %s953_s7 = scalar_lea.vmem (!%p167_p9), %s952_s6, 256 }
  0x14   : > { %842 = vmatprep.subr.bf16.mxu0 (!%p167_p9), %v939_v2  ;;  %883 = vmatpush3.bf16.msra.mxu1 (!%p167_p9), %v940_v3 }
  0x15   : > { %s1220_s29 = smov (!%p193_p10, %s762_s29), 31  ;;  %876 = vmatprep.subr.bf16.mxu1 %v941_v4 }
  0x16   : > { %s763_s10 = sshll.u32 %s1220_s29, 2  ;;  %s1166_s29 = scalar_lea.hbm %s1212_s4, %s793_s20 }
  0x17   : > { %s1101_s13 = scalar_lea.vmem %s1208_s0, %s763_s10 }
  0x18   : > { %v931_v5 = vld [vmem:[%s1101_s13] sm:$0xff]   ;;  %v932_v6 = vld [vmem:[%s1101_s13 + $0x8] sm:$0xff]   ;;  %v933_v7 = vld [vmem:[%s1101_s13 + $0x10] sm:$0xff]   ;;  %884 = vmatpush3.bf16.msra.mxu1 %v941_v4 }
  0x19   : > { %826 = vmatprep.mubr.msk.bf16.mxu0 %vm276_vm0, %v931_v5  ;;  %v934_v9 = vld [vmem:[%s1101_s13 + $0x18] sm:$0xff]   ;;  %877 = vmatprep.subr.bf16.mxu1 %v942_v8  ;;  %v935_v11 = vld [vmem:[%s1101_s13 + $0x20] sm:$0xff]   ;;  %v936_v13 = vld [vmem:[%s1101_s13 + $0x28] sm:$0xff]  }
  0x1a   : > { %827 = vmatmul.mubr.msk.bf16.vlgmr.msra.gmra.mrb[0].mxu0 %vm276_vm0, %v932_v6  ;;  %v937_v14 = vld [vmem:[%s1101_s13 + $0x30] sm:$0xff]   ;;  %v938_v15 = vld [vmem:[%s1101_s13 + $0x38] sm:$0xff]   ;;  %s189_s13 = sand.u32 1, %s1001_s16  }
  0x1b   : > { %830 = vmatprep.mubr.msk.bf16.mxu0 %vm276_vm0, %v933_v7  ;;  %843 = vmatpush3.bf16.msra.mxu0 %v939_v2  ;;  %s761_s14 = sshll.u32 %s189_s13, 3  ;;  %s685_s30 = scalar_lea.sflag [#allocation3], %s189_s13 }
  0x1c   : > { %844 = vmatprep.subr.bf16.mxu0 %v940_v3  ;;  %885 = vmatpush3.bf16.msra.mxu1 %v942_v8  ;;  %s191_s22 = scalar_lea.vmem [#allocation2], %s761_s14 }
  0x1d   : > { %878 = vmatprep.subr.bf16.mxu1 %v943_v10  ;;  %s698_s23 = sshll.u32 %s191_s22, 4  ;;  %s1168_s23 = int_to_ptr.vmem [resolvable:$true] %s698_s23 }
  0x1e   : > { %s947_s19 = scalar_lea.vmem %s1168_s23, 128  ;;  %p954_p0 = scmp.lt.s32.totalorder %s1168_s23, %s952_s6 }
  0x1f   : > { %845 = vmatpush3.bf16.msra.mxu0 %v940_v3  ;;  %p948_p11 = scmp.ne.s32.totalorder %s1168_s23, %s947_s19  ;;  %p955_p1 = scmp.lt.s32.totalorder %s953_s7, %s947_s19 }
  0x20   : > { %846 = vmatprep.subr.bf16.mxu0 %v941_v4  ;;  %886 = vmatpush3.bf16.msra.mxu1 %v943_v10 }
  0x21   : > { %879 = vmatprep.subr.bf16.mxu1 %v944_v12  ;;  %p949_p12 = pnand %p948_p11, %p1075_p5  ;;  %p956_p2 = por %p955_p1, %p954_p0 }
  0x22   : > { %831 = vmatmul.mubr.msk.bf16.gmra.mrb[4].mxu0 %vm276_vm0, %v934_v9 }
  0x23   : > { %834 = vmatprep.mubr.msk.bf16.mxu0 %vm276_vm0, %v935_v11  ;;  %847 = vmatpush3.bf16.msra.mxu0 %v941_v4  ;;  %v1143_v11 = vld [vmem:[%s1211_s3 + $0x1] ss:$0 sm:$0xff]  ;;  %p950_p13 = pneg %p949_p12 }
  0x24   : > { %848 = vmatprep.subr.bf16.mxu0 %v942_v8  ;;  %887 = vmatpush3.bf16.msra.mxu1 %v944_v12 }
  0x25   : > { %880 = vmatprep.subr.bf16.mxu1 %v945_v16  ;;  %p957_p3 = pnand %p956_p2, %p950_p13 }
  0x27   : > { %849 = vmatpush3.bf16.msra.mxu0 %v942_v8 }
  0x28   : > { %850 = vmatprep.subr.bf16.mxu0 %v943_v10  ;;  %888 = vmatpush3.bf16.msra.mxu1 %v945_v16 }
  0x29   : > { %881 = vmatprep.subr.bf16.mxu1 %v946_v17 }
  0x2a   : > { %835 = vmatmul.mubr.msk.bf16.gmra.mrb[8].mxu0 %vm276_vm0, %v936_v13 }
  0x2b   : > { %838 = vmatprep.mubr.msk.bf16.mxu0 %vm276_vm0, %v937_v14  ;;  %851 = vmatpush3.bf16.msra.mxu0 %v943_v10 }
  0x2c   : > { %852 = vmatprep.subr.bf16.mxu0 %v944_v12  ;;  %889 = vmatpush3.bf16.msra.mxu1 %v946_v17 }
  0x2f   : > { %853 = vmatpush3.bf16.msra.mxu0 %v944_v12 }
  0x30   : > { %854 = vmatprep.subr.bf16.mxu0 %v945_v16 }
  0x32   : > { %839 = vmatmul.mubr.msk.bf16.gmra.mrb[12].mxu0 %vm276_vm0, %v938_v15 }
  0x33   : > { %855 = vmatpush3.bf16.msra.mxu0 %v945_v16 }
  0x34   : > { %856 = vmatprep.subr.bf16.mxu0 %v946_v17 }
  0x37   : > { %857 = vmatpush3.bf16.msra.mxu0 %v946_v17 }
  0xed   : > { %v828_v19 = vpop.f32.mrb[0].mxu0 }
  0xee   : > { %v344_v20 = vadd.f32 %v828_v19, %v764_v18  ;;  %v335_v21 = vpop.f32.mrb[1].mxu0 }
  0xef   : > { %v336_v22 = vadd.f32 %v764_v18, %v335_v21  ;;  %v829_v23 = vpop.f32.mrb[2].mxu0 }
  0xf0   : > { %v347_v24 = vadd.f32 %v829_v23, %v764_v18  ;;  %v338_v25 = vpop.f32.mrb[3].mxu0  ;;  %v400_v27 = vmax.f32 %v344_v20, 0.0 }
  0xf1   : > { %v339_v26 = vadd.f32 %v764_v18, %v338_v25  ;;  %v398_v29 = vmax.f32 %v336_v22, 0.0 }
  0xf2   : > { %v401_v28 = vmax.f32 %v347_v24, 0.0 }
  0xf3   : > { %v399_v30 = vmax.f32 %v339_v26, 0.0 }
  0xf4   : > { %v415_v31 = vpack.c.bf16 %v401_v28, %v400_v27 }
  0xf5   : > { %v414_v32 = vpack.c.bf16 %v399_v30, %v398_v29  ;;  %v832_v33 = vpop.f32.mrb[4].mxu0 }
  0xf6   : > { %v360_v34 = vadd.f32 %v832_v33, %v764_v18  ;;  %v351_v35 = vpop.f32.mrb[5].mxu0 }
  0xf7   : > { %v352_v36 = vadd.f32 %v764_v18, %v351_v35  ;;  %v833_v37 = vpop.f32.mrb[6].mxu0  ;;  %858 = vmatprep.mubr.bf16.mxu0 %v414_v32 }
  0xf8   : > { %v363_v38 = vadd.f32 %v833_v37, %v764_v18  ;;  %v354_v39 = vpop.f32.mrb[7].mxu0  ;;  %859 = vmatmul.mubr.bf16.vlgmr.msra.gmra.mrb[16].mxu0 %v415_v31  ;;  %v404_v41 = vmax.f32 %v360_v34, 0.0 }
  0xf9   : > { %v355_v40 = vadd.f32 %v764_v18, %v354_v39  ;;  %v402_v43 = vmax.f32 %v352_v36, 0.0 }
  0xfa   : > { %v405_v42 = vmax.f32 %v363_v38, 0.0 }
  0xfb   : > { %v403_v44 = vmax.f32 %v355_v40, 0.0 }
  0xfc   : > { %v417_v45 = vpack.c.bf16 %v405_v42, %v404_v41 }
  0xfd   : > { %v836_v46 = vpop.f32.mrb[8].mxu0  ;;  %v416_v47 = vpack.c.bf16 %v403_v44, %v402_v43 }
  0xfe   : > { %v376_v48 = vadd.f32 %v836_v46, %v764_v18  ;;  %v367_v49 = vpop.f32.mrb[9].mxu0 }
  0xff   : > { %v368_v50 = vadd.f32 %v764_v18, %v367_v49  ;;  %v837_v51 = vpop.f32.mrb[10].mxu0  ;;  %862 = vmatprep.mubr.bf16.mxu1 %v416_v47 }
 0x100   : > { %v379_v52 = vadd.f32 %v837_v51, %v764_v18  ;;  %v370_v53 = vpop.f32.mrb[11].mxu0  ;;  %863 = vmatmul.mubr.bf16.vlgmr.msra.gmra.mrb[0].mxu1 %v417_v45  ;;  %v408_v55 = vmax.f32 %v376_v48, 0.0 }
 0x101   : > { %v371_v54 = vadd.f32 %v764_v18, %v370_v53  ;;  %v406_v57 = vmax.f32 %v368_v50, 0.0 }
 0x102   : > { %v409_v56 = vmax.f32 %v379_v52, 0.0 }
 0x103   : > { %v407_v58 = vmax.f32 %v371_v54, 0.0 }
 0x104   : > { %v419_v59 = vpack.c.bf16 %v409_v56, %v408_v55 }
 0x105   : > { %v418_v60 = vpack.c.bf16 %v407_v58, %v406_v57  ;;  %v840_v61 = vpop.f32.mrb[12].mxu0 }
 0x106   : > { %v392_v62 = vadd.f32 %v840_v61, %v764_v18  ;;  %v383_v63 = vpop.f32.mrb[13].mxu0 }
 0x107   : > { %v384_v0 = vadd.f32 %v764_v18, %v383_v63  ;;  %v841_v1 = vpop.f32.mrb[14].mxu0  ;;  %866 = vmatprep.mubr.bf16.mxu1 %v418_v60 }
 0x108   : > { %v395_v2 = vadd.f32 %v841_v1, %v764_v18  ;;  %v386_v3 = vpop.f32.mrb[15].mxu0  ;;  %867 = vmatmul.mubr.bf16.gmra.mrb[4].mxu1 %v419_v59  ;;  %v412_v5 = vmax.f32 %v392_v62, 0.0 }
 0x109   : > { %v387_v4 = vadd.f32 %v764_v18, %v386_v3  ;;  %v410_v7 = vmax.f32 %v384_v0, 0.0 }
 0x10a   : > { %v413_v6 = vmax.f32 %v395_v2, 0.0 }
 0x10b   : > { %v411_v8 = vmax.f32 %v387_v4, 0.0 }
 0x10c   : > { %v421_v9 = vpack.c.bf16 %v413_v6, %v412_v5 }
 0x10d   : > { %v420_v10 = vpack.c.bf16 %v411_v8, %v410_v7 }
 0x10f   : > { %870 = vmatprep.mubr.bf16.mxu1 %v420_v10 }
 0x110   : > { %871 = vmatmul.mubr.bf16.gmra.mrb[8].mxu1 %v421_v9 }
 0x1cb   : > { %v860_v12 = vpop.f32.mrb[16].mxu0 }
 0x1cc   : > { %v534_v13 = vadd.f32 %v860_v12, %v1143_v11  ;;  %v525_v14 = vpop.f32.mrb[17].mxu0 }
 0x1cd   : > { %v526_v15 = vadd.f32 %v1143_v11, %v525_v14  ;;  %v861_v16 = vpop.f32.mrb[18].mxu0 }
 0x1ce   : > { %v537_v17 = vadd.f32 %v861_v16, %v1143_v11  ;;  %v528_v18 = vpop.f32.mrb[19].mxu0  ;;  %v590_v20 = vmax.f32 %v534_v13, 0.0 }
 0x1cf   : > { %v529_v19 = vadd.f32 %v1143_v11, %v528_v18  ;;  %v588_v22 = vmax.f32 %v526_v15, 0.0 }
 0x1d0   : > { %v591_v21 = vmax.f32 %v537_v17, 0.0 }
 0x1d1   : > { %v589_v23 = vmax.f32 %v529_v19, 0.0 }
 0x1d2   : > { %v611_v24 = vmax.f32 %v590_v20, %v591_v21 }
 0x1d3   : > { %v604_v25 = vmax.f32 %v588_v22, %v589_v23  ;;  %v864_v26 = vpop.f32.mrb[0].mxu1 }
 0x1d4   : > { %v612_v27 = vrot.slane %v611_v24, 4  ;;  %v550_v28 = vadd.f32 %v864_v26, %v1143_v11  ;;  %v541_v29 = vpop.f32.mrb[1].mxu1 }
 0x1d5   : > { %v605_v30 = vrot.slane %v604_v25, 4  ;;  %v542_v31 = vadd.f32 %v1143_v11, %v541_v29  ;;  %v865_v32 = vpop.f32.mrb[2].mxu1 }
 0x1d6   : > { %v613_v33 = vmax.f32 %v611_v24, %v612_v27  ;;  %v553_v34 = vadd.f32 %v865_v32, %v1143_v11  ;;  %v544_v35 = vpop.f32.mrb[3].mxu1  ;;  %v594_v39 = vmax.f32 %v550_v28, 0.0 }
 0x1d7   : > { %v606_v36 = vmax.f32 %v604_v25, %v605_v30  ;;  %v545_v37 = vadd.f32 %v1143_v11, %v544_v35  ;;  %v592_v42 = vmax.f32 %v542_v31, 0.0 }
 0x1d8   : > { %v614_v38 = vrot.slane %v613_v33, 2  ;;  %v595_v40 = vmax.f32 %v553_v34, 0.0 }
 0x1d9   : > { %v607_v41 = vrot.slane %v606_v36, 2  ;;  %v593_v43 = vmax.f32 %v545_v37, 0.0 }
 0x1da   : > { %v615_v44 = vmax.f32 %v613_v33, %v614_v38  ;;  %v625_v45 = vmax.f32 %v594_v39, %v595_v40 }
 0x1db   : > { %v608_v46 = vmax.f32 %v606_v36, %v607_v41  ;;  %v618_v47 = vmax.f32 %v592_v42, %v593_v43  ;;  %v868_v48 = vpop.f32.mrb[4].mxu1 }
 0x1dc   : > { %v616_v49 = vrot.slane %v615_v44, 1  ;;  %v626_v50 = vrot.slane %v625_v45, 4  ;;  %v566_v51 = vadd.f32 %v868_v48, %v1143_v11  ;;  %v557_v52 = vpop.f32.mrb[5].mxu1 }
 0x1dd   : > { %v609_v53 = vrot.slane %v608_v46, 1  ;;  %v619_v54 = vrot.slane %v618_v47, 4  ;;  %v558_v55 = vadd.f32 %v1143_v11, %v557_v52  ;;  %v869_v56 = vpop.f32.mrb[6].mxu1 }
 0x1de   : > { %v617_v57 = vmax.f32 %v615_v44, %v616_v49  ;;  %v627_v58 = vmax.f32 %v625_v45, %v626_v50  ;;  %v569_v59 = vadd.f32 %v869_v56, %v1143_v11  ;;  %v560_v60 = vpop.f32.mrb[7].mxu1  ;;  %v598_v1 = vmax.f32 %v566_v51, 0.0 }
 0x1df   : > { %v610_v61 = vmax.f32 %v608_v46, %v609_v53  ;;  %v620_v62 = vmax.f32 %v618_v47, %v619_v54  ;;  %v561_v63 = vadd.f32 %v1143_v11, %v560_v60  ;;  %v596_v5 = vmax.f32 %v558_v55, 0.0 }
 0x1e0   : > { %v628_v0 = vrot.slane %v627_v58, 2  ;;  %v599_v2 = vmax.f32 %v569_v59, 0.0 }
 0x1e1   : > { %v669_v3 = vsel %vm668_vm1, %v617_v57, %v610_v61  ;;  %v621_v4 = vrot.slane %v620_v62, 2  ;;  %v597_v6 = vmax.f32 %v561_v63, 0.0 }
 0x1e2   : > { %v629_v7 = vmax.f32 %v627_v58, %v628_v0  ;;  %v639_v8 = vmax.f32 %v598_v1, %v599_v2 }
 0x1e3   : > { %v622_v9 = vmax.f32 %v620_v62, %v621_v4  ;;  %v632_v10 = vmax.f32 %v596_v5, %v597_v6  ;;  %v872_v12 = vpop.f32.mrb[8].mxu1 }
 0x1e4   : > { %v630_v13 = vrot.slane %v629_v7, 1  ;;  %v640_v14 = vrot.slane %v639_v8, 4  ;;  %v582_v15 = vadd.f32 %v872_v12, %v1143_v11  ;;  %v573_v16 = vpop.f32.mrb[9].mxu1 }
 0x1e5   : > { %v623_v17 = vrot.slane %v622_v9, 1  ;;  %v633_v18 = vrot.slane %v632_v10, 4  ;;  %v574_v19 = vadd.f32 %v1143_v11, %v573_v16  ;;  %v873_v20 = vpop.f32.mrb[10].mxu1 }
 0x1e6   : > { %v641_v21 = vmax.f32 %v639_v8, %v640_v14  ;;  %v585_v22 = vadd.f32 %v873_v20, %v1143_v11  ;;  %v576_v23 = vpop.f32.mrb[11].mxu1  ;;  %v631_v27 = vmax.f32 %v629_v7, %v630_v13  ;;  %v602_v29 = vmax.f32 %v582_v15, 0.0 }
 0x1e7   : > { %v624_v24 = vmax.f32 %v622_v9, %v623_v17  ;;  %v634_v25 = vmax.f32 %v632_v10, %v633_v18  ;;  %v577_v26 = vadd.f32 %v1143_v11, %v576_v23  ;;  %v600_v33 = vmax.f32 %v574_v19, 0.0 }
 0x1e8   : > { %v642_v28 = vrot.slane %v641_v21, 2  ;;  %v603_v30 = vmax.f32 %v585_v22, 0.0 }
 0x1e9   : > { %v671_v31 = vsel %vm670_vm2, %v624_v24, %v669_v3  ;;  %v635_v32 = vrot.slane %v634_v25, 2  ;;  %v601_v34 = vmax.f32 %v577_v26, 0.0 }
 0x1ea   : > { %v643_v35 = vmax.f32 %v641_v21, %v642_v28  ;;  %v653_v36 = vmax.f32 %v602_v29, %v603_v30  ;;  %v673_v37 = vsel %vm672_vm3, %v631_v27, %v671_v31 }
 0x1eb   : > { %v636_v38 = vmax.f32 %v634_v25, %v635_v32  ;;  %v646_v39 = vmax.f32 %v600_v33, %v601_v34 }
 0x1ec   : > { %v644_v40 = vrot.slane %v643_v35, 1  ;;  %v654_v41 = vrot.slane %v653_v36, 4 }
 0x1ed   : > { %v637_v42 = vrot.slane %v636_v38, 1  ;;  %v647_v43 = vrot.slane %v646_v39, 4 }
 0x1ee   : > { %v655_v11 = vmax.f32 %v653_v36, %v654_v41  ;;  %v645_v46 = vmax.f32 %v643_v35, %v644_v40 }
 0x1ef   : > { %v638_v44 = vmax.f32 %v636_v38, %v637_v42  ;;  %v648_v45 = vmax.f32 %v646_v39, %v647_v43 }
 0x1f0   : > { %v656_v47 = vrot.slane %v655_v11, 2 }
 0x1f1   : > { %v649_v48 = vrot.slane %v648_v45, 2  ;;  %v675_v49 = vsel %vm674_vm4, %v638_v44, %v673_v37 }
 0x1f2   : > { %v657_v50 = vmax.f32 %v655_v11, %v656_v47  ;;  %v677_v51 = vsel %vm676_vm5, %v645_v46, %v675_v49 }
 0x1f3   : > { %v650_v52 = vmax.f32 %v648_v45, %v649_v48 }
 0x1f4   : > { %v658_v53 = vrot.slane %v657_v50, 1 }
 0x1f5   : > { %v651_v54 = vrot.slane %v650_v52, 1 }
 0x1f6   : > { %v659_v56 = vmax.f32 %v657_v50, %v658_v53 }
 0x1f7   : > { %v652_v55 = vmax.f32 %v650_v52, %v651_v54 }
 0x1f9   : > { %v679_v57 = vsel %vm678_vm6, %v652_v55, %v677_v51 }
 0x1fa   : > { %v681_v58 = vsel %vm680_vm7, %v659_v56, %v679_v57 }
 0x1fb   : > { %683 = vst [vmem:[%s191_s22] sm:$0xff] %v681_v58 }
 0x1fc   : > { %960 = shalt.err (!%p957_p3)
}
 0x1fd   : > { %s961_s8 = scalar_lea.hbm %s1166_s29, 128  ;;  %s965_s11 = scalar_lea.hbm %s1212_s4, 256 }
 0x1fe   : > { %p962_p4 = scmp.ne.s32.totalorder %s1166_s29, %s961_s8  ;;  %p966_p9 = scmp.lt.u32.totalorder %s1166_s29, %s1212_s4 }
 0x1ff   : > { %p967_p10 = scmp.lt.u32.totalorder %s965_s11, %s961_s8  ;;  %p969_p12 = scmp.lt.u32.totalorder %s961_s8, %s1166_s29 }
 0x200   : > { %p963_p7 = pnand %p962_p4, %p1075_p5 }
 0x201   : > { %p968_p11 = por %p967_p10, %p966_p9 }
 0x202   : > { %p964_p8 = pneg %p963_p7 }
 0x203   : > { %p970_p13 = por %p969_p12, %p968_p11 }
 0x205   : > { %p971_p0 = pnand %p970_p13, %p964_p8 }
 0x207   : > { %974 = shalt.err (!%p971_p0)
}
 0x208   : > { %890 = dma.vmem_to_hbm [thread:$0]  (%p1075_p5), %s1168_s23, 128, %s1166_s29, %s685_s30  }
 0x209 PF: > { %p896_p1 = scmp.ge.s32.totalorder %s1009_s18, 2  ;;  %s710_s14 = sand.u32 1, %s997_s15  }
 0x20a   : > { %s711_s20 = scalar_lea.sflag [#allocation3], %s710_s14 }
 0x20b   : > { %p893_p2 = pnand %p896_p1, %p1079_p6 }
 0x20d   : > { %992 = dma.done.wait (!%p893_p2), %s711_s20, 128  }
 0x20e   : > { %994 = vsyncadd (!%p893_p2), %s711_s20, 4294967168  ;;  %p14_p3 = scmp.ge.s32.totalorder %s1062_s21, 4   ;;  %s1215_s15 = smov %s1001_s16 }
 0x20f   : > { %s1216_s16 = smov %s1005_s17  ;;  %s1217_s17 = smov %s1073_s24 }
 0x210   : > { %s1218_s18 = smov %s1062_s21  ;;  %16 = sbr.rel (!%p14_p3) target bundleno = 3 (0x3), region = 71 }
 0x217   :  { %716 = vsyncpa [#allocation3], 1 }
 0x218   :  { %718 = vsyncpa [#allocation3 + $0x1], 1 }

</bundles_post_ra>
